<compile_context>
chip_gen: v7x
topology: tpu7x:2x2x1
jax: 0.10.0
libtpu: 0.0.40
codegen_flags: <defaults>
</compile_context>

<pallas_src>
import jax
import jax.numpy as jnp
from jax.experimental import pallas as pl
from jax.experimental.pallas import tpu as pltpu


def dqn_kernel(idx_ref, fused_t_ref, w2_t_ref, b2_ref, w3_t_ref, b3_ref,
               out_ref):
    idx = idx_ref[...]                                 # (1, TILE_N) int32
    tn = idx.shape[1]
    v = fused_t_ref.shape[1]

    # One-hot, already transposed: one_hot_t[v, n] = (v == idx[n]).
    iota = jax.lax.broadcasted_iota(jnp.int32, (v, tn), 0)
    one_hot_t = (iota == idx).astype(jnp.bfloat16)     # (V, TILE_N)

    # Layer 1 (embedding + Linear1 + b1 folded into fused table), transposed:
    # h = fused^T @ one_hot^T  -> (64, TILE_N), then ReLU.
    h = jnp.dot(fused_t_ref[...], one_hot_t,
                preferred_element_type=jnp.float32)
    h = jnp.maximum(h, 0.0)

    # Layer 2: (64, 64) @ (64, TILE_N) + b2 -> ReLU
    h = jnp.dot(w2_t_ref[...], h.astype(jnp.bfloat16),
                preferred_element_type=jnp.float32) + b2_ref[...]
    h = jnp.maximum(h, 0.0)

    # Layer 3: (A, 64) @ (64, TILE_N) + b3, lane-dense f32 store of (A, TILE_N).
    out_ref[...] = (jnp.dot(w3_t_ref[...], h.astype(jnp.bfloat16),
                            preferred_element_type=jnp.float32) + b3_ref[...])


def prepare_params(params):
    """One-time weight prep (hoist out of the per-step forward)."""
    emb, w1, b1, w2, b2, w3, b3 = params
    fused_t = (jnp.dot(emb, w1) + b1).T.astype(jnp.bfloat16)   # (64, V)
    w2_t = w2.T.astype(jnp.bfloat16)                           # (64, 64)
    b2_c = b2.T.astype(jnp.float32)                            # (64, 1)
    w3_t = w3.T.astype(jnp.bfloat16)                           # (A, 64)
    b3_c = b3.T.astype(jnp.float32)                            # (A, 1)
    return fused_t, w2_t, b2_c, w3_t, b3_c


def dqn_forward(indices, prepared, tile_n=2048):
    """indices: int array (batch, seq). Returns (batch, seq, A) float32."""
    fused_t, w2_t, b2_c, w3_t, b3_c = prepared
    batch, seq = indices.shape
    a = w3_t.shape[0]

    idx_flat = indices.reshape(1, -1).astype(jnp.int32)        # lane-major
    n = idx_flat.shape[1]

    # Tile: multiple of 128 lanes, at most tile_n, and at most ~N/2 so the
    # "parallel" grid has >=2 steps for v7x's two TensorCores when N is big.
    half = 128 * pl.cdiv(pl.cdiv(n, 2), 128)
    tn = min(tile_n, half)
    n_pad = tn * pl.cdiv(n, tn)
    if n_pad != n:
        idx_flat = jnp.pad(idx_flat, ((0, 0), (0, n_pad - n)))

    grid = (n_pad // tn,)

    out = pl.pallas_call(
        dqn_kernel,
        out_shape=jax.ShapeDtypeStruct((a, n_pad), jnp.float32),
        grid_spec=pltpu.PrefetchScalarGridSpec(
            num_scalar_prefetch=0,
            grid=grid,
            in_specs=[
                pl.BlockSpec((1, tn), lambda i: (0, i)),         # indices
                pl.BlockSpec(fused_t.shape, lambda i: (0, 0)),   # (emb@w1+b1)^T
                pl.BlockSpec(w2_t.shape, lambda i: (0, 0)),      # w2^T
                pl.BlockSpec(b2_c.shape, lambda i: (0, 0)),      # b2 column
                pl.BlockSpec(w3_t.shape, lambda i: (0, 0)),      # w3^T
                pl.BlockSpec(b3_c.shape, lambda i: (0, 0)),      # b3 column
            ],
            out_specs=pl.BlockSpec((a, tn), lambda i: (0, i)),
        ),
        compiler_params=pltpu.CompilerParams(
            dimension_semantics=("parallel",),
            vmem_limit_bytes=32 * 1024 * 1024,
        ),
    )(idx_flat, fused_t, w2_t, b2_c, w3_t, b3_c)

    # (A, N) -> (batch, seq, A); the sliced/transposed copy is only A lanes
    # wide, i.e. ~16x cheaper than slicing a 128-lane padded buffer.
    return out[:, :n].T.reshape(batch, seq, a)


def init_params(key, obs_space, action_space, embedding_dim=64):
    ks = jax.random.split(key, 7)
    scale = 0.1
    emb = scale * jax.random.normal(ks[0], (obs_space, embedding_dim), jnp.float32)
    w1 = scale * jax.random.normal(ks[1], (embedding_dim, 64), jnp.float32)
    b1 = scale * jax.random.normal(ks[2], (1, 64), jnp.float32)
    w2 = scale * jax.random.normal(ks[3], (64, 64), jnp.float32)
    b2 = scale * jax.random.normal(ks[4], (1, 64), jnp.float32)
    w3 = scale * jax.random.normal(ks[5], (64, action_space), jnp.float32)
    b3 = scale * jax.random.normal(ks[6], (1, action_space), jnp.float32)
    return (emb, w1, b1, w2, b2, w3, b3)


def dqn_reference(indices, params):
    """Pure-JAX f32 reference matching the PyTorch forward semantics."""
    emb, w1, b1, w2, b2, w3, b3 = params
    x = jnp.take(emb, indices, axis=0)                  # embedding lookup
    h = jnp.maximum(x @ w1 + b1[0], 0.0)
    h = jnp.maximum(h @ w2 + b2[0], 0.0)
    return h @ w3 + b3[0]


if __name__ == "__main__":
    obs_space = 128
    action_space = 8
    embedding_dim = 64
    batch, seq = 2, 8

    key = jax.random.PRNGKey(0)
    k_idx, k_params = jax.random.split(key)

    params = init_params(k_params, obs_space, action_space, embedding_dim)
    indices = jax.random.randint(k_idx, (batch, seq), 0, obs_space, jnp.int32)

    prepared = prepare_params(params)       # one-time weight prep
    out = dqn_forward(indices, prepared)
    out = jax.block_until_ready(out)

    ref = dqn_reference(indices, params)
    assert out.shape == (batch, seq, action_space)
    assert jnp.allclose(out, ref, rtol=1e-2, atol=1e-2)

    print("KERNEL_OK")
</pallas_src>

<mosaic_0001>
module attributes {stable_mosaic.version = 11 : i64} {
  func.func @dqn_kernel(%arg0: i32, %arg1: memref<1x128xi32, #tpu.memory_space<vmem>>, %arg2: memref<64x128xbf16, #tpu.memory_space<vmem>>, %arg3: memref<64x64xbf16, #tpu.memory_space<vmem>>, %arg4: memref<64x1xf32, #tpu.memory_space<vmem>>, %arg5: memref<8x64xbf16, #tpu.memory_space<vmem>>, %arg6: memref<8x1xf32, #tpu.memory_space<vmem>>, %arg7: memref<8x128xf32, #tpu.memory_space<vmem>>) attributes {dimension_semantics = [#tpu.dimension_semantics<parallel>], iteration_bounds = array<i64: 1>, scalar_prefetch = 0 : i64, scratch_operands = 0 : i64, tpu.core_type = #tpu.core_type<tc>, window_params = [{transform_indices = @transform_0, window_bounds = array<i64: 1, 128>}, {pipeline_mode = #tpu.pipeline_mode<synchronous>, transform_indices = @transform_1, window_bounds = array<i64: 64, 128>}, {pipeline_mode = #tpu.pipeline_mode<synchronous>, transform_indices = @transform_2, window_bounds = array<i64: 64, 64>}, {pipeline_mode = #tpu.pipeline_mode<synchronous>, transform_indices = @transform_3, window_bounds = array<i64: 64, 1>}, {pipeline_mode = #tpu.pipeline_mode<synchronous>, transform_indices = @transform_4, window_bounds = array<i64: 8, 64>}, {pipeline_mode = #tpu.pipeline_mode<synchronous>, transform_indices = @transform_5, window_bounds = array<i64: 8, 1>}, {transform_indices = @transform_6, window_bounds = array<i64: 8, 128>}]} {
    %c0 = arith.constant 0 : index
    %c0_0 = arith.constant 0 : index
    %0 = vector.load %arg1[%c0, %c0_0] : memref<1x128xi32, #tpu.memory_space<vmem>>, vector<1x128xi32>
    %1 = tpu.iota {dimensions = array<i32: 0>} : vector<128x128xi32>
    %2 = vector.broadcast %0 : vector<1x128xi32> to vector<128x128xi32>
    %3 = arith.cmpi eq, %1, %2 : vector<128x128xi32>
    %4 = arith.extui %3 : vector<128x128xi1> to vector<128x128xi32>
    %5 = arith.sitofp %4 : vector<128x128xi32> to vector<128x128xf32>
    %6 = arith.truncf %5 : vector<128x128xf32> to vector<128x128xbf16>
    %c0_1 = arith.constant 0 : index
    %c0_2 = arith.constant 0 : index
    %7 = vector.load %arg2[%c0_1, %c0_2] : memref<64x128xbf16, #tpu.memory_space<vmem>>, vector<64x128xbf16>
    %cst = arith.constant dense<0.000000e+00> : vector<64x128xf32>
    %8 = tpu.matmul %7, %6, %cst {dimension_numbers = #tpu.dot_dimension_numbers<[1], [0], [0], [1], [0, 0, 1, 1], [], []>} : vector<64x128xbf16>, vector<128x128xbf16>, vector<64x128xf32> -> vector<64x128xf32>
    %cst_3 = arith.constant 0.000000e+00 : f32
    %9 = vector.broadcast %cst_3 : f32 to vector<64x128xf32>
    %10 = arith.maximumf %8, %9 : vector<64x128xf32>
    %c0_4 = arith.constant 0 : index
    %c0_5 = arith.constant 0 : index
    %11 = vector.load %arg3[%c0_4, %c0_5] : memref<64x64xbf16, #tpu.memory_space<vmem>>, vector<64x64xbf16>
    %12 = arith.truncf %10 : vector<64x128xf32> to vector<64x128xbf16>
    %cst_6 = arith.constant dense<0.000000e+00> : vector<64x128xf32>
    %13 = tpu.matmul %11, %12, %cst_6 {dimension_numbers = #tpu.dot_dimension_numbers<[1], [0], [0], [1], [0, 0, 1, 1], [], []>} : vector<64x64xbf16>, vector<64x128xbf16>, vector<64x128xf32> -> vector<64x128xf32>
    %c0_7 = arith.constant 0 : index
    %c0_8 = arith.constant 0 : index
    %14 = vector.load %arg4[%c0_7, %c0_8] : memref<64x1xf32, #tpu.memory_space<vmem>>, vector<64x1xf32>
    %15 = vector.broadcast %14 : vector<64x1xf32> to vector<64x128xf32>
    %16 = arith.addf %13, %15 : vector<64x128xf32>
    %cst_9 = arith.constant 0.000000e+00 : f32
    %17 = vector.broadcast %cst_9 : f32 to vector<64x128xf32>
    %18 = arith.maximumf %16, %17 : vector<64x128xf32>
    %c0_10 = arith.constant 0 : index
    %c0_11 = arith.constant 0 : index
    %19 = vector.load %arg5[%c0_10, %c0_11] : memref<8x64xbf16, #tpu.memory_space<vmem>>, vector<8x64xbf16>
    %20 = arith.truncf %18 : vector<64x128xf32> to vector<64x128xbf16>
    %cst_12 = arith.constant dense<0.000000e+00> : vector<8x128xf32>
    %21 = tpu.matmul %19, %20, %cst_12 {dimension_numbers = #tpu.dot_dimension_numbers<[1], [0], [0], [1], [0, 0, 1, 1], [], []>} : vector<8x64xbf16>, vector<64x128xbf16>, vector<8x128xf32> -> vector<8x128xf32>
    %c0_13 = arith.constant 0 : index
    %c0_14 = arith.constant 0 : index
    %22 = vector.load %arg6[%c0_13, %c0_14] : memref<8x1xf32, #tpu.memory_space<vmem>>, vector<8x1xf32>
    %23 = vector.broadcast %22 : vector<8x1xf32> to vector<8x128xf32>
    %24 = arith.addf %21, %23 : vector<8x128xf32>
    %c0_15 = arith.constant 0 : index
    %c0_16 = arith.constant 0 : index
    %25 = vector.load %arg7[%c0_15, %c0_16] : memref<8x128xf32, #tpu.memory_space<vmem>>, vector<8x128xf32>
    tpu.vector_store %arg7[%c0_15, %c0_16], %24 {strides = array<i32>} : memref<8x128xf32, #tpu.memory_space<vmem>>, vector<8x128xf32>,
    return
  }
  func.func @transform_0(%arg0: i32) -> (i32, i32) {
    %c0_i32 = arith.constant 0 : i32
    %c0_i32_0 = arith.constant 0 : i32
    return %c0_i32, %arg0 : i32, i32
  }
  func.func @transform_1(%arg0: i32) -> (i32, i32) {
    %c0_i32 = arith.constant 0 : i32
    %c0_i32_0 = arith.constant 0 : i32
    %c0_i32_1 = arith.constant 0 : i32
    return %c0_i32, %c0_i32_0 : i32, i32
  }
  func.func @transform_2(%arg0: i32) -> (i32, i32) {
    %c0_i32 = arith.constant 0 : i32
    %c0_i32_0 = arith.constant 0 : i32
    %c0_i32_1 = arith.constant 0 : i32
    return %c0_i32, %c0_i32_0 : i32, i32
  }
  func.func @transform_3(%arg0: i32) -> (i32, i32) {
    %c0_i32 = arith.constant 0 : i32
    %c0_i32_0 = arith.constant 0 : i32
    %c0_i32_1 = arith.constant 0 : i32
    return %c0_i32, %c0_i32_0 : i32, i32
  }
  func.func @transform_4(%arg0: i32) -> (i32, i32) {
    %c0_i32 = arith.constant 0 : i32
    %c0_i32_0 = arith.constant 0 : i32
    %c0_i32_1 = arith.constant 0 : i32
    return %c0_i32, %c0_i32_0 : i32, i32
  }
  func.func @transform_5(%arg0: i32) -> (i32, i32) {
    %c0_i32 = arith.constant 0 : i32
    %c0_i32_0 = arith.constant 0 : i32
    %c0_i32_1 = arith.constant 0 : i32
    return %c0_i32, %c0_i32_0 : i32, i32
  }
  func.func @transform_6(%arg0: i32) -> (i32, i32) {
    %c0_i32 = arith.constant 0 : i32
    %c0_i32_0 = arith.constant 0 : i32
    return %c0_i32, %arg0 : i32, i32
  }
}

</mosaic_0001>

<bundles_post_ra>
// kernel: tpu_custom_call.1
= control target key start
LH: loop header
LB: loop body
LE: loop exit
PB: predicated region body
PF: predicated region fallthrough
CT: control target
= control target key end

     0   :  { %v26_v1 = vlaneseq  ;;  %v605_v11 = vmov 1.0|1.0   ;;  %s719_s0 = inlined_call_operand.vmem [shape: s32[1,128], index: 0, kind: input, shape index: {}]   ;;  %s720_s1 = inlined_call_operand.vmem [shape: bf16[64,128], index: 1, kind: input, shape index: {}]   ;;  %s721_s2 = inlined_call_operand.vmem [shape: bf16[64,64], index: 2, kind: input, shape index: {}]   ;;  %s722_s3 = inlined_call_operand.vmem [shape: f32[64,1], index: 3, kind: input, shape index: {}]   ;;  %s723_s4 = inlined_call_operand.vmem [shape: bf16[8,64], index: 4, kind: input, shape index: {}]   ;;  %s724_s5 = inlined_call_operand.vmem [shape: f32[8,1], index: 5, kind: input, shape index: {}]   ;;  %s725_s6 = inlined_call_operand.hbm [shape: f32[8,128], index: 6, kind: output, shape index: {}]  }
   0x1   :  { %v443_v0 = vld [vmem:[%s719_s0] ss:$0 sm:$0xff] }
   0x2   :  { %v573_v2 = vld [vmem:[%s720_s1] sm:$0xff]   ;;  %v27_v3 = vshrl.u32 %v26_v1, 7 }
   0x3   :  { %530 = vmatprep.mubr.bf16.mxu0 %v573_v2 }
   0x4   :  { %v28_v4 = vadd.s32 8, %v27_v3  ;;  %vm47_vm0 = vcmp.eq.s32.totalorder %v27_v3, %v443_v0  ;;  %v29_v5 = vadd.s32 16, %v27_v3  ;;  %v30_v6 = vadd.s32 24, %v27_v3 }
   0x5   :  { %v31_v7 = vadd.s32 32, %v27_v3  ;;  %v32_v8 = vadd.s32 40, %v27_v3  ;;  %v33_v9 = vadd.s32 48, %v27_v3  ;;  %v34_v10 = vadd.s32 56, %v27_v3 }
   0x6   :  { %vm48_vm1 = vcmp.eq.s32.totalorder %v28_v4, %v443_v0  ;;  %vm49_vm2 = vcmp.eq.s32.totalorder %v29_v5, %v443_v0  ;;  %vm50_vm3 = vcmp.eq.s32.totalorder %v30_v6, %v443_v0  ;;  %v35_v12 = vadd.s32 64, %v27_v3 }
   0x7   :  { %vm464_vm4 = vmpackc.low %vm48_vm1, %vm47_vm0  ;;  %vm51_vm6 = vcmp.eq.s32.totalorder %v31_v7, %v443_v0  ;;  %vm52_vm7 = vcmp.eq.s32.totalorder %v32_v8, %v443_v0  ;;  %vm53_vm9 = vcmp.eq.s32.totalorder %v33_v9, %v443_v0  ;;  %vm54_vm10 = vcmp.eq.s32.totalorder %v34_v10, %v443_v0 }
   0x8   :  { %514 = vmatprep.subr.msk.bf16.mxu0 %vm464_vm4, %v605_v11  ;;  %vm466_vm5 = vmpackc.low %vm50_vm3, %vm49_vm2  ;;  %v36_v13 = vadd.s32 72, %v27_v3 }
   0x9   :  { %515 = vmatpush3.bf16.msk.msra.mxu0 %vm464_vm4, %v605_v11  ;;  %vm468_vm8 = vmpackc.low %vm52_vm7, %vm51_vm6 }
   0xa   :  { %516 = vmatprep.subr.msk.bf16.mxu0 %vm466_vm5, %v605_v11  ;;  %vm470_vm11 = vmpackc.low %vm54_vm10, %vm53_vm9 }
   0xd   :  { %517 = vmatpush3.bf16.msk.msra.mxu0 %vm466_vm5, %v605_v11 }
   0xe   :  { %518 = vmatprep.subr.msk.bf16.mxu0 %vm468_vm8, %v605_v11 }
   0xf   :  { %11 = vsyncpa [#allocation3], 0  ;;  %vm55_vm12 = vcmp.eq.s32.totalorder %v35_v12, %v443_v0  ;;  %vm56_vm13 = vcmp.eq.s32.totalorder %v36_v13, %v443_v0  ;;  %v37_v14 = vadd.s32 80, %v27_v3  ;;  %v38_v15 = vadd.s32 88, %v27_v3  ;;  %v574_v20 = vld [vmem:[%s720_s1 + $0x8] sm:$0xff]   ;;  %v575_v21 = vld [vmem:[%s720_s1 + $0x10] sm:$0xff]  }
  0x10   :  { %vm472_vm14 = vmpackc.low %vm56_vm13, %vm55_vm12  ;;  %v39_v16 = vadd.s32 96, %v27_v3  ;;  %v40_v17 = vadd.s32 104, %v27_v3  ;;  %v41_v18 = vadd.s32 112, %v27_v3  ;;  %v42_v19 = vadd.s32 120, %v27_v3  ;;  %v576_v22 = vld [vmem:[%s720_s1 + $0x18] sm:$0xff]   ;;  %v577_v23 = vld [vmem:[%s721_s2] sm:$0xff]  }
  0x11   :  { %519 = vmatpush3.bf16.msk.msra.mxu0 %vm468_vm8, %v605_v11  ;;  %vm57_vm15 = vcmp.eq.s32.totalorder %v37_v14, %v443_v0  ;;  %vm58_vm0 = vcmp.eq.s32.totalorder %v38_v15, %v443_v0  ;;  %vm288_vm8 = vcmask 523264   ;;  %v220_v24 = vld [vmem:[%s722_s3] sm:$0xff]  ;;  %v222_v25 = vld [vmem:[%s722_s3 + $0x10] sm:$0xff]  ;;  %v606_v26 = vmov 0   ;;  %v221_v27 = vld [vmem:[%s722_s3 + $0x8] sm:$0xff]  ;;  %s609_s29 = smov [#allocation2]  }
  0x12   :  { %520 = vmatprep.subr.msk.bf16.mxu0 %vm470_vm11, %v605_v11  ;;  %vm474_vm1 = vmpackc.low %vm58_vm0, %vm57_vm15  ;;  %vm59_vm2 = vcmp.eq.s32.totalorder %v39_v16, %v443_v0  ;;  %vm60_vm3 = vcmp.eq.s32.totalorder %v40_v17, %v443_v0  ;;  %vm61_vm5 = vcmp.eq.s32.totalorder %v41_v18, %v443_v0  ;;  %vm62_vm6 = vcmp.eq.s32.totalorder %v42_v19, %v443_v0  ;;  %v223_v28 = vld [vmem:[%s722_s3 + $0x18] sm:$0xff]  ;;  %v224_v29 = vld [vmem:[%s722_s3 + $0x20] sm:$0xff]  ;;  %s435_s30 = sshll.u32 %s609_s29, 4  ;;  %s436_s30 = int_to_ptr.vmem [resolvable:$true] %s435_s30 }
  0x13   :  { %vm476_vm4 = vmpackc.low %vm60_vm3, %vm59_vm2  ;;  %546 = vmatprep.mubr.msk.bf16.mxu1 %vm288_vm8, %v577_v23  ;;  %571 = vset.pattern.permute.xlu0 %v606_v26  ;;  %v225_v30 = vld [vmem:[%s722_s3 + $0x28] sm:$0xff]  ;;  %v226_v31 = vld [vmem:[%s722_s3 + $0x30] sm:$0xff]  ;;  %v607_v57 = vmov 0.0   ;;  %vm608_vm9 = vmmov 0   ;;  %s581_s7 = scalar_lea.vmem %s436_s30, 128  ;;  %p586_p1 = scmp.lt.s32.totalorder %s436_s30, %s436_s30 }
  0x14   :  { %vm478_vm7 = vmpackc.low %vm62_vm6, %vm61_vm5  ;;  %572 = vset.pattern.permute.xlu1 %v606_v26  ;;  %230 = vperm.xlu0 %571, %v220_v24   ;;  %v227_v32 = vld [vmem:[%s722_s3 + $0x38] sm:$0xff]  ;;  %v379_v33 = vld [vmem:[%s724_s5] sm:$0xff]  ;;  %p582_p0 = scmp.ne.s32.totalorder %s436_s30, %s581_s7  ;;  %p587_p2 = scmp.lt.s32.totalorder %s581_s7, %s581_s7 }
  0x15   :  { %521 = vmatpush3.bf16.msk.msra.mxu0 %vm470_vm11, %v605_v11  ;;  %240 = vperm.xlu1 %572, %v222_v25   ;;  %v578_v54 = vld [vmem:[%s721_s2 + $0x8] sm:$0xff]   ;;  %v579_v55 = vld [vmem:[%s721_s2 + $0x10] sm:$0xff]   ;;  %v580_v56 = vld [vmem:[%s721_s2 + $0x18] sm:$0xff]  }
  0x16   :  { %522 = vmatprep.subr.msk.bf16.mxu0 %vm472_vm14, %v605_v11  ;;  %p588_p3 = por %p587_p2, %p586_p1 }
  0x18   :  { %235 = vperm.xlu0 %571, %v221_v27   ;;  %p589_p4 = pnand %p588_p3, %p582_p0 }
  0x19   :  { %523 = vmatpush3.bf16.msk.msra.mxu0 %vm472_vm14, %v605_v11  ;;  %245 = vperm.xlu1 %572, %v223_v28  }
  0x1a   :  { %524 = vmatprep.subr.msk.bf16.mxu0 %vm474_vm1, %v605_v11 }
  0x1c   :  { %250 = vperm.xlu0 %571, %v224_v29  }
  0x1d   :  { %525 = vmatpush3.bf16.msk.msra.mxu0 %vm474_vm1, %v605_v11  ;;  %255 = vperm.xlu1 %572, %v225_v30   ;;  %v374_v30 = vld [vmem:[%s723_s4] sm:$0xf] }
  0x1e   :  { %526 = vmatprep.subr.msk.bf16.mxu0 %vm476_vm4, %v605_v11 }
  0x20   :  { %260 = vperm.xlu0 %571, %v226_v31  }
  0x21   :  { %527 = vmatpush3.bf16.msk.msra.mxu0 %vm476_vm4, %v605_v11  ;;  %265 = vperm.xlu1 %572, %v227_v32  }
  0x22   :  { %528 = vmatprep.subr.msk.bf16.mxu0 %vm478_vm7, %v605_v11 }
  0x24   :  { %382 = vperm.xlu0 %571, %v379_v33  }
  0x25   :  { %529 = vmatpush3.bf16.msk.msra.mxu0 %vm478_vm7, %v605_v11 }
  0x28   :  { %531 = vmatmul.mubr.bf16.vlgmr.msra.gmra.mrb[0].mxu0 %v574_v20 }
  0x29   :  { %534 = vmatprep.mubr.bf16.mxu0 %v575_v21 }
  0x30   :  { %535 = vmatmul.mubr.bf16.gmra.mrb[4].mxu0 %v576_v22 }
  0x93   :  { %v231_v58 = vpop.permute.xlu0 %230 }
  0x94   :  { %v241_v59 = vpop.permute.xlu1 %240 }
  0x97   :  { %v236_v60 = vpop.permute.xlu0 %235 }
  0x98   :  { %v246_v61 = vpop.permute.xlu1 %245 }
  0x9b   :  { %v251_v1 = vpop.permute.xlu0 %250 }
  0x9c   :  { %v256_v6 = vpop.permute.xlu1 %255 }
  0x9f   :  { %v261_v13 = vpop.permute.xlu0 %260 }
  0xa0   :  { %v266_v18 = vpop.permute.xlu1 %265 }
  0xa3   :  { %v383_v31 = vpop.permute.xlu0 %382 }
  0xfb   :  { %v532_v34 = vpop.f32.mrb[0].mxu0 }
  0xfc   :  { %v169_v35 = vpop.f32.mrb[1].mxu0  ;;  %v202_v37 = vmax.f32 %v532_v34, 0.0 }
  0xfd   :  { %v533_v36 = vpop.f32.mrb[2].mxu0  ;;  %v200_v40 = vmax.f32 %v169_v35, 0.0 }
  0xfe   :  { %v203_v38 = vmax.f32 %v533_v36, 0.0  ;;  %v172_v39 = vpop.f32.mrb[3].mxu0 }
  0xff   :  { %v201_v41 = vmax.f32 %v172_v39, 0.0 }
 0x100   :  { %v217_v42 = vpack.c.bf16 %v203_v38, %v202_v37 }
 0x101   :  { %v216_v43 = vpack.c.bf16 %v201_v41, %v200_v40 }
 0x103   :  { %v536_v44 = vpop.f32.mrb[4].mxu0  ;;  %538 = vmatprep.subr.bf16.mxu1 %v216_v43 }
 0x104   :  { %v185_v45 = vpop.f32.mrb[5].mxu0  ;;  %539 = vmatpush3.bf16.msra.mxu1 %v216_v43  ;;  %v206_v47 = vmax.f32 %v536_v44, 0.0 }
 0x105   :  { %v537_v46 = vpop.f32.mrb[6].mxu0  ;;  %540 = vmatprep.subr.bf16.mxu1 %v217_v42  ;;  %v204_v50 = vmax.f32 %v185_v45, 0.0 }
 0x106   :  { %v207_v48 = vmax.f32 %v537_v46, 0.0  ;;  %v188_v49 = vpop.f32.mrb[7].mxu0 }
 0x107   :  { %v205_v51 = vmax.f32 %v188_v49, 0.0 }
 0x108   :  { %v219_v52 = vpack.c.bf16 %v207_v48, %v206_v47  ;;  %541 = vmatpush3.bf16.msra.mxu1 %v217_v42 }
 0x109   :  { %v218_v53 = vpack.c.bf16 %v205_v51, %v204_v50 }
 0x10b   :  { %542 = vmatprep.subr.bf16.mxu1 %v218_v53 }
 0x10c   :  { %543 = vmatpush3.bf16.msra.mxu1 %v218_v53 }
 0x10d   :  { %544 = vmatprep.subr.bf16.mxu1 %v219_v52 }
 0x110   :  { %545 = vmatpush3.bf16.msra.mxu1 %v219_v52 }
 0x111   :  { %554 = vmatprep.subr.bf16.mxu1 %v607_v57 }
 0x113   :  { %547 = vmatmul.mubr.msk.bf16.vlgmr.msra.gmra.mrb[0].mxu1 %vm288_vm8, %v578_v54 }
 0x114   :  { %550 = vmatprep.mubr.msk.bf16.mxu1 %vm288_vm8, %v579_v55 }
 0x11b   :  { %551 = vmatmul.mubr.msk.bf16.gmra.mrb[4].mxu1 %vm288_vm8, %v580_v56 }
 0x11c   :  { %562 = vmatprep.mubr.msk.bf16.mxu1 %vm608_vm9, %v607_v57 }
 0x1e6   :  { %v548_v62 = vpop.f32.mrb[0].mxu1 }
 0x1e7   :  { %v344_v63 = vadd.f32 %v548_v62, %v241_v59  ;;  %v335_v0 = vpop.f32.mrb[1].mxu1 }
 0x1e8   :  { %v336_v2 = vadd.f32 %v335_v0, %v231_v58  ;;  %v549_v3 = vpop.f32.mrb[2].mxu1 }
 0x1e9   :  { %v347_v4 = vadd.f32 %v549_v3, %v246_v61  ;;  %v338_v5 = vpop.f32.mrb[3].mxu1  ;;  %v368_v8 = vmax.f32 %v344_v63, 0.0 }
 0x1ea   :  { %v339_v7 = vadd.f32 %v338_v5, %v236_v60  ;;  %v366_v10 = vmax.f32 %v336_v2, 0.0 }
 0x1eb   :  { %v369_v9 = vmax.f32 %v347_v4, 0.0 }
 0x1ec   :  { %v367_v11 = vmax.f32 %v339_v7, 0.0 }
 0x1ed   :  { %v376_v12 = vpack.c.bf16 %v369_v9, %v368_v8 }
 0x1ee   :  { %v375_v14 = vpack.c.bf16 %v367_v11, %v366_v10  ;;  %v552_v15 = vpop.f32.mrb[4].mxu1 }
 0x1ef   :  { %v360_v16 = vadd.f32 %v552_v15, %v261_v13  ;;  %v351_v17 = vpop.f32.mrb[5].mxu1 }
 0x1f0   :  { %v352_v19 = vadd.f32 %v351_v17, %v251_v1  ;;  %v553_v20 = vpop.f32.mrb[6].mxu1  ;;  %555 = vmatpush3.bf16.msra.mxu1 %v375_v14 }
 0x1f1   :  { %v363_v21 = vadd.f32 %v553_v20, %v266_v18  ;;  %v354_v22 = vpop.f32.mrb[7].mxu1  ;;  %556 = vmatprep.subr.bf16.mxu1 %v607_v57  ;;  %v372_v24 = vmax.f32 %v360_v16, 0.0 }
 0x1f2   :  { %v355_v23 = vadd.f32 %v354_v22, %v256_v6  ;;  %v370_v26 = vmax.f32 %v352_v19, 0.0 }
 0x1f3   :  { %v373_v25 = vmax.f32 %v363_v21, 0.0 }
 0x1f4   :  { %v371_v27 = vmax.f32 %v355_v23, 0.0  ;;  %557 = vmatpush3.bf16.msra.mxu1 %v376_v12 }
 0x1f5   :  { %v378_v28 = vpack.c.bf16 %v373_v25, %v372_v24  ;;  %558 = vmatprep.subr.bf16.mxu1 %v607_v57 }
 0x1f6   :  { %v377_v29 = vpack.c.bf16 %v371_v27, %v370_v26 }
 0x1f8   :  { %559 = vmatpush3.bf16.msra.mxu1 %v377_v29 }
 0x1f9   :  { %560 = vmatprep.subr.bf16.mxu1 %v607_v57 }
 0x1fc   :  { %561 = vmatpush3.bf16.msra.mxu1 %v378_v28 }
 0x1ff   :  { %563 = vmatmul.mubr.msk.bf16.vlgmr.msra.gmra.mrb[8].mxu1 %vm288_vm8, %v374_v30 }
 0x2d2   :  { %v422_v32 = vpop.f32.mrb[8].mxu1 }
 0x2d3   :  { %v423_v33 = vadd.f32 %v422_v32, %v383_v31  ;;  %v564_v34 = vpop.f32.mrb[9].mxu1 }
 0x2d4   :  { %v425_v35 = vpop.f32.mrb[10].mxu1 }
 0x2d5   :  { %428 = vst [vmem:[#allocation2] sm:$0xff] %v423_v33  ;;  %v565_v36 = vpop.f32.mrb[11].mxu1 }
 0x2d6   :  { %592 = shalt.err (!%p589_p4)
}
 0x2d7   :  { %s593_s9 = scalar_lea.hbm %s725_s6, 128 }
 0x2d8   :  { %p594_p5 = scmp.ne.s32.totalorder %s725_s6, %s593_s9  ;;  %p597_p6 = scmp.lt.u32.totalorder %s593_s9, %s725_s6 }
 0x2da   :  { %p599_p7 = pnand %p597_p6, %p594_p5 }
 0x2dc   :  { %602 = shalt.err (!%p599_p7)
}
 0x2dd   :  { %438 = dma.vmem_to_hbm [thread:$0]  %s436_s30, 128, %s725_s6, [#allocation3]  }
 0x2de   :  { %603 = dma.done.wait [#allocation3], 128  }
 0x2df   :  { %604 = vsyncadd [#allocation3], 4294967168 }
 0x2e0   :  { %442 = vsyncpa [#allocation3], 1 }

</bundles_post_ra>
